<compile_context>
chip_gen: v6e
topology: v6e:2x2x1
jax: 0.10.0
libtpu: 0.0.40
codegen_flags: <defaults>
</compile_context>

<pallas_src>
import functools

import jax
import jax.numpy as jnp
from jax.experimental import pallas as pl
from jax.experimental.pallas import tpu as pltpu


_FUSED_SLAB_BYTES = 6 * 1024 * 1024     # per-batch (C, H*W) slab threshold
_STREAM_BLOCK_BYTES = 4 * 1024 * 1024   # per x block in the streaming path


def _rup(x, m):
    return ((x + m - 1) // m) * m


# -----------------------------------------------------------------------------
# Shared in-kernel MLP: mlp(avg) + mlp(max) evaluated as ONE width-2 matmul pair
# -----------------------------------------------------------------------------
def _mlp_pair(w1, b1, w2, b2, avg, mx):
    """w1:(Hd,C) b1:(Hd,1) w2:(C,Hd) b2:(C,1); avg/mx:(C,1) -> gamma:(C,1)."""
    c = avg.shape[0]
    # Build the (C, 2) operand [avg | max] with a select (robust lowering; no
    # lane-minor concatenate needed).
    col = jax.lax.broadcasted_iota(jnp.int32, (c, 2), 1)
    pooled = jnp.where(col == 0, avg, mx)                               # (C, 2)
    h = jnp.dot(w1, pooled, preferred_element_type=jnp.float32) + b1    # (Hd,2)
    h = jnp.maximum(h, 0.0)                                             # ReLU
    y = jnp.dot(w2, h, preferred_element_type=jnp.float32)              # (C, 2)
    # mlp(avg) + mlp(max) = sum of the two columns + 2 * b2
    return jnp.sum(y, axis=-1, keepdims=True) + 2.0 * b2                # (C, 1)


# -----------------------------------------------------------------------------
# Kernel A: fused single-pass (pool + MLP + scale), grid = (B,)
# -----------------------------------------------------------------------------
def _make_fused_kernel(hw):
    inv_hw = 1.0 / float(hw)

    def kernel(x_ref, w1_ref, b1_ref, w2_ref, b2_ref, o_ref):
        x = x_ref[0].astype(jnp.float32)                       # (C, HW)
        avg = jnp.sum(x, axis=-1, keepdims=True) * inv_hw      # (C, 1)
        mx = jnp.max(x, axis=-1, keepdims=True)                # (C, 1)
        gamma = _mlp_pair(w1_ref[...], b1_ref[...], w2_ref[...], b2_ref[...],
                          avg, mx)                             # (C, 1)
        o_ref[0] = (x * gamma).astype(o_ref.dtype)

    return kernel


# -----------------------------------------------------------------------------
# Kernel B1: streaming pool + MLP -> gamma, grid = (B, n_spatial_tiles)
# -----------------------------------------------------------------------------
def _make_pool_mlp_kernel(hw_true, t_hw):
    needs_edge = (hw_true % t_hw) != 0
    inv_hw = 1.0 / float(hw_true)

    def kernel(x_ref, w1_ref, b1_ref, w2_ref, b2_ref, gamma_ref, sum_acc, max_acc):
        t = pl.program_id(1)
        last = pl.num_programs(1) - 1

        @pl.when(t == 0)
        def _init():
            sum_acc[...] = jnp.zeros_like(sum_acc)
            max_acc[...] = jnp.full_like(max_acc, -jnp.inf)

        x = x_ref[0].astype(jnp.float32)                        # (C, t_hw)

        def accumulate(xs, xm):
            sum_acc[...] = sum_acc[...] + jnp.sum(xs, axis=-1, keepdims=True)
            max_acc[...] = jnp.maximum(max_acc[...],
                                       jnp.max(xm, axis=-1, keepdims=True))

        if needs_edge:
            # Interior tiles: pure load -> reduce -> accumulate (no selects).
            @pl.when(t != last)
            def _interior():
                accumulate(x, x)

            # Edge tile only: lanes past H*W are *undefined* (no explicit HBM
            # pad any more), so both the sum and the max must be masked here.
            @pl.when(t == last)
            def _edge():
                lane = jax.lax.broadcasted_iota(jnp.int32, x.shape, 1) + t * t_hw
                valid = lane < hw_true
                accumulate(jnp.where(valid, x, 0.0),
                           jnp.where(valid, x, -jnp.inf))
        else:
            accumulate(x, x)

        @pl.when(t == last)
        def _finalize():
            avg = sum_acc[...] * inv_hw
            gamma_ref[0] = _mlp_pair(w1_ref[...], b1_ref[...], w2_ref[...],
                                     b2_ref[...], avg, max_acc[...]
                                     ).astype(gamma_ref.dtype)

    return kernel


# -----------------------------------------------------------------------------
# Kernel B2: streaming scale, grid = (B, n_spatial_tiles); edge output stores
# are masked automatically for the non-divisible last block.
# -----------------------------------------------------------------------------
def _scale_kernel(x_ref, gamma_ref, o_ref):
    o_ref[0] = (x_ref[0].astype(jnp.float32) * gamma_ref[0]).astype(o_ref.dtype)


# -----------------------------------------------------------------------------
# Wrapper
# -----------------------------------------------------------------------------
def _pick_spatial_tile(c, hw, itemsize):
    t = (_STREAM_BLOCK_BYTES // (c * itemsize)) // 128 * 128
    t = max(128, t)
    return min(t, _rup(hw, 128))


@functools.partial(jax.jit, static_argnames=("force_streaming", "spatial_tile"))
def channel_attention_forward(x, params, force_streaming=False, spatial_tile=None):
    """x: (B, C, H, W); params hold torch-layout Linear weights (f32)."""
    B, C, H, W = x.shape
    HW = H * W
    hidden = params["w1"].shape[0]
    itemsize = jnp.dtype(x.dtype).itemsize
    fbytes = 4

    # Free metadata reshape -- no HBM copy.
    x3 = x.reshape(B, C, HW)
    w1 = params["w1"].astype(jnp.float32)                     # (hidden, C)
    b1 = params["b1"].astype(jnp.float32).reshape(hidden, 1)  # (hidden, 1)
    w2 = params["w2"].astype(jnp.float32)                     # (C, hidden)
    b2 = params["b2"].astype(jnp.float32).reshape(C, 1)       # (C, 1)

    weight_specs = [
        pl.BlockSpec((hidden, C), lambda b, *_: (0, 0)),
        pl.BlockSpec((hidden, 1), lambda b, *_: (0, 0)),
        pl.BlockSpec((C, hidden), lambda b, *_: (0, 0)),
        pl.BlockSpec((C, 1), lambda b, *_: (0, 0)),
    ]
    weight_bytes = (hidden * C * 2 + hidden + C) * fbytes

    slab_bytes = C * HW * itemsize
    use_fused = (not force_streaming) and slab_bytes <= _FUSED_SLAB_BYTES

    if use_fused:
        # ---- single pass: 1 read + 1 write of x ----
        out3 = pl.pallas_call(
            _make_fused_kernel(HW),
            out_shape=jax.ShapeDtypeStruct((B, C, HW), x.dtype),
            grid=(B,),
            in_specs=[pl.BlockSpec((1, C, HW), lambda b: (b, 0, 0))] + weight_specs,
            out_specs=pl.BlockSpec((1, C, HW), lambda b: (b, 0, 0)),
            compiler_params=pltpu.CompilerParams(
                dimension_semantics=("parallel",),
                vmem_limit_bytes=48 * 1024 * 1024),
            cost_estimate=pl.CostEstimate(
                flops=B * (3 * C * HW + 8 * C * hidden),
                transcendentals=0,
                bytes_accessed=2 * B * C * HW * itemsize + weight_bytes),
        )(x3, w1, b1, w2, b2)
        return out3.reshape(B, C, H, W)

    # ---- streaming fallback: 2 reads + 1 write of x ----
    t_hw = spatial_tile if spatial_tile is not None else _pick_spatial_tile(C, HW, itemsize)
    n_t = pl.cdiv(HW, t_hw)

    gamma = pl.pallas_call(
        _make_pool_mlp_kernel(HW, t_hw),
        out_shape=jax.ShapeDtypeStruct((B, C, 1), jnp.float32),
        grid=(B, n_t),
        in_specs=[pl.BlockSpec((1, C, t_hw), lambda b, t: (b, 0, t))] + weight_specs,
        out_specs=pl.BlockSpec((1, C, 1), lambda b, t: (b, 0, 0)),
        scratch_shapes=[pltpu.VMEM((C, 1), jnp.float32),    # running sum
                        pltpu.VMEM((C, 1), jnp.float32)],   # running max
        compiler_params=pltpu.CompilerParams(
            dimension_semantics=("parallel", "arbitrary"),
            vmem_limit_bytes=32 * 1024 * 1024),
        cost_estimate=pl.CostEstimate(
            flops=B * (2 * C * HW + 8 * C * hidden),
            transcendentals=0,
            bytes_accessed=B * C * HW * itemsize + weight_bytes),
    )(x3, w1, b1, w2, b2)

    out3 = pl.pallas_call(
        _scale_kernel,
        out_shape=jax.ShapeDtypeStruct((B, C, HW), x.dtype),
        grid=(B, n_t),
        in_specs=[
            pl.BlockSpec((1, C, t_hw), lambda b, t: (b, 0, t)),
            pl.BlockSpec((1, C, 1), lambda b, t: (b, 0, 0)),
        ],
        out_specs=pl.BlockSpec((1, C, t_hw), lambda b, t: (b, 0, t)),
        compiler_params=pltpu.CompilerParams(
            dimension_semantics=("parallel", "parallel"),
            vmem_limit_bytes=32 * 1024 * 1024),
        cost_estimate=pl.CostEstimate(
            flops=B * C * HW,
            transcendentals=0,
            bytes_accessed=2 * B * C * HW * itemsize),
    )(x3, gamma)

    return out3.reshape(B, C, H, W)


# -----------------------------------------------------------------------------
# Deterministic init (PyTorch nn.Linear default) and pure-JAX reference
# -----------------------------------------------------------------------------
def init_channel_attention_params(key, nf, reduction_ratio=16):
    c = 2 * nf
    hidden = c // reduction_ratio
    k1, k2, k3, k4 = jax.random.split(key, 4)
    lim1 = 1.0 / (c ** 0.5)
    lim2 = 1.0 / (hidden ** 0.5)
    return {
        "w1": jax.random.uniform(k1, (hidden, c), jnp.float32, -lim1, lim1),
        "b1": jax.random.uniform(k2, (hidden,), jnp.float32, -lim1, lim1),
        "w2": jax.random.uniform(k3, (c, hidden), jnp.float32, -lim2, lim2),
        "b2": jax.random.uniform(k4, (c,), jnp.float32, -lim2, lim2),
    }


def channel_attention_reference(x, p):
    avg = jnp.mean(x, axis=(2, 3))
    mx = jnp.max(x, axis=(2, 3))

    def mlp(v):
        h = jnp.maximum(v @ p["w1"].T + p["b1"], 0.0)
        return h @ p["w2"].T + p["b2"]

    gamma = mlp(avg) + mlp(mx)
    return x * gamma[:, :, None, None]


if __name__ == "__main__":
    key = jax.random.PRNGKey(0)
    k_x1, k_x2, k_p = jax.random.split(key, 3)

    nf = 64                                  # fused feature has 2*nf = 128 channels
    C = 2 * nf
    params = init_channel_attention_params(k_p, nf)

    # Path 1: fused single-pass (per-batch slab resident in VMEM).
    x1 = jax.random.normal(k_x1, (2, C, 16, 16), jnp.float32)
    out1 = jax.block_until_ready(channel_attention_forward(x1, params))
    ref1 = channel_attention_reference(x1, params)
    assert out1.shape == x1.shape
    assert bool(jnp.all(jnp.isfinite(out1)))
    assert bool(jnp.allclose(out1, ref1, rtol=1e-3, atol=1e-3)), \
        float(jnp.max(jnp.abs(out1 - ref1)))

    # Path 2: streaming two-kernel path, forced, with a ragged edge tile
    # (H*W = 289, tile = 128 -> 3 tiles, last one masked; no pad / slice).
    x2 = jax.random.normal(k_x2, (2, C, 17, 17), jnp.float32)
    out2 = jax.block_until_ready(
        channel_attention_forward(x2, params, force_streaming=True, spatial_tile=128))
    ref2 = channel_attention_reference(x2, params)
    assert out2.shape == x2.shape
    assert bool(jnp.all(jnp.isfinite(out2)))
    assert bool(jnp.allclose(out2, ref2, rtol=1e-3, atol=1e-3)), \
        float(jnp.max(jnp.abs(out2 - ref2)))

    print("KERNEL_OK")
</pallas_src>

<mosaic_0001>
module attributes {stable_mosaic.version = 11 : i64} {
  func.func @kernel(%arg0: i32, %arg1: memref<1x128x256xf32, #tpu.memory_space<vmem>>, %arg2: memref<8x128xf32, #tpu.memory_space<vmem>>, %arg3: memref<8x1xf32, #tpu.memory_space<vmem>>, %arg4: memref<128x8xf32, #tpu.memory_space<vmem>>, %arg5: memref<128x1xf32, #tpu.memory_space<vmem>>, %arg6: memref<1x128x256xf32, #tpu.memory_space<vmem>>) attributes {dimension_semantics = [#tpu.dimension_semantics<parallel>], iteration_bounds = array<i64: 2>, scalar_prefetch = 0 : i64, scratch_operands = 0 : i64, tpu.core_type = #tpu.core_type<tc>, window_params = [{transform_indices = @transform_0, window_bounds = array<i64: 1, 128, 256>}, {pipeline_mode = #tpu.pipeline_mode<synchronous>, transform_indices = @transform_1, window_bounds = array<i64: 8, 128>}, {pipeline_mode = #tpu.pipeline_mode<synchronous>, transform_indices = @transform_2, window_bounds = array<i64: 8, 1>}, {pipeline_mode = #tpu.pipeline_mode<synchronous>, transform_indices = @transform_3, window_bounds = array<i64: 128, 8>}, {pipeline_mode = #tpu.pipeline_mode<synchronous>, transform_indices = @transform_4, window_bounds = array<i64: 128, 1>}, {transform_indices = @transform_5, window_bounds = array<i64: 1, 128, 256>}]} {
    %c0 = arith.constant 0 : index
    %c0_0 = arith.constant 0 : index
    %c0_1 = arith.constant 0 : index
    %0 = vector.load %arg1[%c0, %c0_0, %c0_1] : memref<1x128x256xf32, #tpu.memory_space<vmem>>, vector<1x128x256xf32>
    %1 = vector.shape_cast %0 : vector<1x128x256xf32> to vector<128x256xf32>
    %cst = arith.constant dense<0.000000e+00> : vector<128xf32>
    %2 = vector.multi_reduction <add>, %1, %cst [1] : vector<128x256xf32> to vector<128xf32>
    %3 = vector.shape_cast %2 : vector<128xf32> to vector<128x1xf32>
    %cst_2 = arith.constant 3.906250e-03 : f32
    %4 = vector.broadcast %cst_2 : f32 to vector<128x1xf32>
    %5 = arith.mulf %3, %4 : vector<128x1xf32>
    %cst_3 = arith.constant dense<0xFF800000> : vector<128xf32>
    %6 = vector.multi_reduction <maximumf>, %1, %cst_3 [1] : vector<128x256xf32> to vector<128xf32>
    %7 = vector.shape_cast %6 : vector<128xf32> to vector<128x1xf32>
    %c0_4 = arith.constant 0 : index
    %c0_5 = arith.constant 0 : index
    %8 = vector.load %arg2[%c0_4, %c0_5] : memref<8x128xf32, #tpu.memory_space<vmem>>, vector<8x128xf32>
    %c0_6 = arith.constant 0 : index
    %c0_7 = arith.constant 0 : index
    %9 = vector.load %arg3[%c0_6, %c0_7] : memref<8x1xf32, #tpu.memory_space<vmem>>, vector<8x1xf32>
    %c0_8 = arith.constant 0 : index
    %c0_9 = arith.constant 0 : index
    %10 = vector.load %arg4[%c0_8, %c0_9] : memref<128x8xf32, #tpu.memory_space<vmem>>, vector<128x8xf32>
    %c0_10 = arith.constant 0 : index
    %c0_11 = arith.constant 0 : index
    %11 = vector.load %arg5[%c0_10, %c0_11] : memref<128x1xf32, #tpu.memory_space<vmem>>, vector<128x1xf32>
    %12 = tpu.iota {dimensions = array<i32: 1>} : vector<128x2xi32>
    %c0_i32 = arith.constant 0 : i32
    %13 = vector.broadcast %c0_i32 : i32 to vector<128x2xi32>
    %14 = arith.cmpi eq, %12, %13 : vector<128x2xi32>
    %15 = vector.shape_cast %5 : vector<128x1xf32> to vector<128x1xf32>
    %16 = vector.broadcast %15 : vector<128x1xf32> to vector<128x2xf32>
    %17 = vector.shape_cast %7 : vector<128x1xf32> to vector<128x1xf32>
    %18 = vector.broadcast %17 : vector<128x1xf32> to vector<128x2xf32>
    %19 = arith.select %14, %16, %18 : vector<128x2xi1>, vector<128x2xf32>
    %cst_12 = arith.constant dense<0.000000e+00> : vector<8x2xf32>
    %20 = tpu.matmul %8, %19, %cst_12 {dimension_numbers = #tpu.dot_dimension_numbers<[1], [0], [0], [1], [0, 0, 1, 1], [], []>} : vector<8x128xf32>, vector<128x2xf32>, vector<8x2xf32> -> vector<8x2xf32>
    %21 = vector.broadcast %9 : vector<8x1xf32> to vector<8x2xf32>
    %22 = arith.addf %20, %21 : vector<8x2xf32>
    %cst_13 = arith.constant 0.000000e+00 : f32
    %23 = vector.broadcast %cst_13 : f32 to vector<8x2xf32>
    %24 = arith.maximumf %22, %23 : vector<8x2xf32>
    %cst_14 = arith.constant dense<0.000000e+00> : vector<128x2xf32>
    %25 = tpu.matmul %10, %24, %cst_14 {dimension_numbers = #tpu.dot_dimension_numbers<[1], [0], [0], [1], [0, 0, 1, 1], [], []>} : vector<128x8xf32>, vector<8x2xf32>, vector<128x2xf32> -> vector<128x2xf32>
    %cst_15 = arith.constant dense<0.000000e+00> : vector<128xf32>
    %26 = vector.multi_reduction <add>, %25, %cst_15 [1] : vector<128x2xf32> to vector<128xf32>
    %27 = vector.shape_cast %26 : vector<128xf32> to vector<128x1xf32>
    %cst_16 = arith.constant 2.000000e+00 : f32
    %28 = vector.broadcast %cst_16 : f32 to vector<128x1xf32>
    %29 = arith.mulf %28, %11 : vector<128x1xf32>
    %30 = arith.addf %27, %29 : vector<128x1xf32>
    %31 = vector.broadcast %30 : vector<128x1xf32> to vector<128x256xf32>
    %32 = arith.mulf %1, %31 : vector<128x256xf32>
    %c0_17 = arith.constant 0 : index
    %c0_18 = arith.constant 0 : index
    %c0_19 = arith.constant 0 : index
    %33 = vector.load %arg6[%c0_17, %c0_18, %c0_19] : memref<1x128x256xf32, #tpu.memory_space<vmem>>, vector<1x128x256xf32>
    %34 = vector.shape_cast %33 : vector<1x128x256xf32> to vector<128x256xf32>
    %35 = vector.shape_cast %32 : vector<128x256xf32> to vector<1x128x256xf32>
    tpu.vector_store %arg6[%c0_17, %c0_18, %c0_19], %35 {strides = array<i32>} : memref<1x128x256xf32, #tpu.memory_space<vmem>>, vector<1x128x256xf32>,
    return
  }
  func.func @transform_0(%arg0: i32) -> (i32, i32, i32) {
    %c0_i32 = arith.constant 0 : i32
    %c0_i32_0 = arith.constant 0 : i32
    %c0_i32_1 = arith.constant 0 : i32
    return %arg0, %c0_i32, %c0_i32_0 : i32, i32, i32
  }
  func.func @transform_1(%arg0: i32) -> (i32, i32) {
    %c0_i32 = arith.constant 0 : i32
    %c0_i32_0 = arith.constant 0 : i32
    %c0_i32_1 = arith.constant 0 : i32
    return %c0_i32, %c0_i32_0 : i32, i32
  }
  func.func @transform_2(%arg0: i32) -> (i32, i32) {
    %c0_i32 = arith.constant 0 : i32
    %c0_i32_0 = arith.constant 0 : i32
    %c0_i32_1 = arith.constant 0 : i32
    return %c0_i32, %c0_i32_0 : i32, i32
  }
  func.func @transform_3(%arg0: i32) -> (i32, i32) {
    %c0_i32 = arith.constant 0 : i32
    %c0_i32_0 = arith.constant 0 : i32
    %c0_i32_1 = arith.constant 0 : i32
    return %c0_i32, %c0_i32_0 : i32, i32
  }
  func.func @transform_4(%arg0: i32) -> (i32, i32) {
    %c0_i32 = arith.constant 0 : i32
    %c0_i32_0 = arith.constant 0 : i32
    %c0_i32_1 = arith.constant 0 : i32
    return %c0_i32, %c0_i32_0 : i32, i32
  }
  func.func @transform_5(%arg0: i32) -> (i32, i32, i32) {
    %c0_i32 = arith.constant 0 : i32
    %c0_i32_0 = arith.constant 0 : i32
    %c0_i32_1 = arith.constant 0 : i32
    return %arg0, %c0_i32, %c0_i32_0 : i32, i32, i32
  }
}

</mosaic_0001>

<bundles_post_ra>
// kernel: channel_attention_forward.1
= control target key start
LH: loop header
LB: loop body
LE: loop exit
PB: predicated region body
PF: predicated region fallthrough
CT: control target
= control target key end

     0   :  { %s1150_s18 = smov 0   ;;  %s1588_s0 = inlined_call_operand.vmem [shape: f32[2,128,256], index: 0, kind: input, shape index: {}]   ;;  %s1589_s1 = inlined_call_operand.vmem [shape: f32[8,128], index: 1, kind: input, shape index: {}]   ;;  %s1590_s2 = inlined_call_operand.vmem [shape: f32[8,1], index: 2, kind: input, shape index: {}]   ;;  %s1591_s3 = inlined_call_operand.vmem [shape: f32[128,8], index: 3, kind: input, shape index: {}]   ;;  %s1592_s4 = inlined_call_operand.vmem [shape: f32[128,1], index: 4, kind: input, shape index: {}]   ;;  %s1593_s5 = inlined_call_operand.vmem [shape: f32[2,128,256], index: 5, kind: output, shape index: {}]  }
   0x1 LB: > { %s972_s19 = sadd.s32 4294967295, %s1115_s18   ;;  %p976_p0 = scmp.ge.s32.totalorder %s1115_s18, 1  ;;  %s1115_s18 = sphi %s1150_s18, %s15_s18  }
   0x2   : > { %p187_p1 = scmp.lt.s32.totalorder %s1115_s18, 3 }
   0x4   : > { %p188_p2 = pnand %p976_p0, %p187_p1 }
   0x5   : > { %p215_p3 = scmp.lt.s32.totalorder (!%p188_p2), %s972_s19, 1 }
   0x6   : > { %191 = sbr.rel (%p188_p2) target bundleno = 935 (0x3a7), region = 40 }
   0xb   : > { %s1595_s19 = smov (!%p215_p3, %s972_s19), 1  ;;  %v1117_v20 = vmov 0.0   ;;  %vm1118_vm0 = vmmov 0   ;;  %vm498_vm2 = vcmask 64512   ;;  %vm692_vm3 = vcmask 15360  }
   0xc   : > { %s999_s20 = sshll.u32 %s1595_s19, 8  ;;  %1035 = vmatprep.subr.mxu0 %v1117_v20  ;;  %1067 = vmatprep.mubr.msk.f32.mxu0 %vm1118_vm0, %v1117_v20 }
   0xd   : > { %s1166_s23 = scalar_lea.vmem %s1588_s0, %s999_s20  ;;  %s1519_s28 = scalar_lea.vmem %s1593_s5, %s999_s20 }
   0xe   : > { %v1169_v0 = vld [vmem:[%s1166_s23 + $0xf0] sm:$0xff]  ;;  %v1172_v1 = vld [vmem:[%s1166_s23 + $0xf8] sm:$0xff]  ;;  %v1175_v2 = vld [vmem:[%s1166_s23 + $0xe0] sm:$0xff] }
   0xf   : > { %v366_v3 = vmax.f32 %v1169_v0, %v1172_v1  ;;  %v302_v4 = vadd.f32 %v1172_v1, %v1169_v0  ;;  %v1182_v5 = vld [vmem:[%s1166_s23 + $0xe8] sm:$0xff]  ;;  %v1185_v6 = vld [vmem:[%s1166_s23 + $0xd0] sm:$0xff]  ;;  %v1188_v7 = vld [vmem:[%s1166_s23 + $0xd8] sm:$0xff] }
  0x10   : > { %v299_v8 = vadd.f32 %v1182_v5, %v1175_v2  ;;  %v296_v9 = vadd.f32 %v1188_v7, %v1185_v6  ;;  %v1195_v10 = vld [vmem:[%s1166_s23 + $0xc0] sm:$0xff]  ;;  %v1198_v11 = vld [vmem:[%s1166_s23 + $0xc8] sm:$0xff]  ;;  %v363_v12 = vmax.f32 %v1175_v2, %v1182_v5  ;;  %v1205_v14 = vld [vmem:[%s1166_s23 + $0xb0] sm:$0xff]  ;;  %v360_v16 = vmax.f32 %v1185_v6, %v1188_v7 }
  0x11   : > { %367 = vmax.xlane.f32.xlu1 %v366_v3  ;;  %303 = vadd.xlane.f32.xlu0 %v302_v4  ;;  %v293_v13 = vadd.f32 %v1198_v11, %v1195_v10  ;;  %v1208_v15 = vld [vmem:[%s1166_s23 + $0xb8] sm:$0xff]  ;;  %v1215_v18 = vld [vmem:[%s1166_s23 + $0xa0] sm:$0xff]  ;;  %v1218_v19 = vld [vmem:[%s1166_s23 + $0xa8] sm:$0xff]  ;;  %v357_v21 = vmax.f32 %v1195_v10, %v1198_v11  ;;  %v1119_v4 = vmov 0  }
  0x12   : > { %v290_v17 = vadd.f32 %v1208_v15, %v1205_v14  ;;  %v287_v22 = vadd.f32 %v1218_v19, %v1215_v18  ;;  %v1226_v23 = vld [vmem:[%s1166_s23 + $0x90] sm:$0xff]  ;;  %v1229_v24 = vld [vmem:[%s1166_s23 + $0x98] sm:$0xff]  ;;  %v354_v25 = vmax.f32 %v1205_v14, %v1208_v15  ;;  %v1236_v27 = vld [vmem:[%s1166_s23 + $0x80] sm:$0xff]  ;;  %v351_v29 = vmax.f32 %v1215_v18, %v1218_v19  ;;  %1107 = vset.pattern.permute.xlu0 %v1119_v4 }
  0x13   : > { %v284_v26 = vadd.f32 %v1229_v24, %v1226_v23  ;;  %v1239_v28 = vld [vmem:[%s1166_s23 + $0x88] sm:$0xff]  ;;  %v1246_v31 = vld [vmem:[%s1166_s23 + $0x70] sm:$0xff]  ;;  %v1249_v32 = vld [vmem:[%s1166_s23 + $0x78] sm:$0xff]  ;;  %v348_v33 = vmax.f32 %v1226_v23, %v1229_v24  ;;  %1108 = vset.pattern.permute.xlu1 %v1119_v4 }
  0x14   : > { %v281_v30 = vadd.f32 %v1239_v28, %v1236_v27  ;;  %v278_v34 = vadd.f32 %v1249_v32, %v1246_v31  ;;  %v1256_v35 = vld [vmem:[%s1166_s23 + $0x60] sm:$0xff]  ;;  %v1259_v36 = vld [vmem:[%s1166_s23 + $0x68] sm:$0xff]  ;;  %v345_v37 = vmax.f32 %v1236_v27, %v1239_v28  ;;  %v1266_v39 = vld [vmem:[%s1166_s23 + $0x50] sm:$0xff]  ;;  %v342_v41 = vmax.f32 %v1246_v31, %v1249_v32 }
  0x15   : > { %300 = vadd.xlane.f32.xlu0 %v299_v8  ;;  %297 = vadd.xlane.f32.xlu1 %v296_v9  ;;  %v275_v38 = vadd.f32 %v1259_v36, %v1256_v35  ;;  %v1269_v40 = vld [vmem:[%s1166_s23 + $0x58] sm:$0xff]  ;;  %v1276_v43 = vld [vmem:[%s1166_s23 + $0x40] sm:$0xff]  ;;  %v1279_v44 = vld [vmem:[%s1166_s23 + $0x48] sm:$0xff]  ;;  %v339_v45 = vmax.f32 %v1256_v35, %v1259_v36  ;;  %v403_v9 = vlaneseq }
  0x16   : > { %v272_v42 = vadd.f32 %v1269_v40, %v1266_v39  ;;  %v269_v46 = vadd.f32 %v1279_v44, %v1276_v43  ;;  %v1286_v47 = vld [vmem:[%s1166_s23 + $0x30] sm:$0xff]  ;;  %v1289_v48 = vld [vmem:[%s1166_s23 + $0x38] sm:$0xff]  ;;  %v336_v49 = vmax.f32 %v1266_v39, %v1269_v40  ;;  %v1296_v51 = vld [vmem:[%s1166_s23 + $0x20] sm:$0xff]  ;;  %v333_v53 = vmax.f32 %v1276_v43, %v1279_v44 }
  0x17   : > { %v266_v50 = vadd.f32 %v1289_v48, %v1286_v47  ;;  %v1299_v52 = vld [vmem:[%s1166_s23 + $0x28] sm:$0xff]  ;;  %v1306_v55 = vld [vmem:[%s1166_s23 + $0x10] sm:$0xff]  ;;  %v1309_v56 = vld [vmem:[%s1166_s23 + $0x18] sm:$0xff]  ;;  %v330_v57 = vmax.f32 %v1286_v47, %v1289_v48 }
  0x18   : > { %v263_v54 = vadd.f32 %v1299_v52, %v1296_v51  ;;  %v260_v58 = vadd.f32 %v1309_v56, %v1306_v55  ;;  %v1316_v59 = vld [vmem:[%s1166_s23] sm:$0xff]  ;;  %v1319_v60 = vld [vmem:[%s1166_s23 + $0x8] sm:$0xff]  ;;  %v327_v61 = vmax.f32 %v1296_v51, %v1299_v52  ;;  %v324_v63 = vmax.f32 %v1306_v55, %v1309_v56 }
  0x19   : > { %364 = vmax.xlane.f32.xlu0 %v363_v12  ;;  %294 = vadd.xlane.f32.xlu1 %v293_v13  ;;  %v257_v62 = vadd.f32 %v1319_v60, %v1316_v59  ;;  %v321_v3 = vmax.f32 %v1316_v59, %v1319_v60  ;;  %v370_v8 = vld [vmem:[%s1590_s2] sm:$0xff]  ;;  %v1333_v12 = vand.u32 127, %v403_v9 }
  0x1b   : > { %vm405_vm1 = vcmp.eq.s32.totalorder %v1333_v12, 0  ;;  %v373_v12 = vld [vmem:[%s1591_s3 + $0x10] sm:$0xff] }
  0x1d   : > { %361 = vmax.xlane.f32.xlu0 %v360_v16  ;;  %291 = vadd.xlane.f32.xlu1 %v290_v17 }
  0x21   : > { %358 = vmax.xlane.f32.xlu0 %v357_v21  ;;  %288 = vadd.xlane.f32.xlu1 %v287_v22 }
  0x25   : > { %355 = vmax.xlane.f32.xlu0 %v354_v25  ;;  %285 = vadd.xlane.f32.xlu1 %v284_v26 }
  0x29   : > { %352 = vmax.xlane.f32.xlu0 %v351_v29  ;;  %282 = vadd.xlane.f32.xlu1 %v281_v30 }
  0x2d   : > { %349 = vmax.xlane.f32.xlu0 %v348_v33  ;;  %279 = vadd.xlane.f32.xlu1 %v278_v34 }
  0x31   : > { %346 = vmax.xlane.f32.xlu0 %v345_v37  ;;  %276 = vadd.xlane.f32.xlu1 %v275_v38 }
  0x35   : > { %343 = vmax.xlane.f32.xlu0 %v342_v41  ;;  %273 = vadd.xlane.f32.xlu1 %v272_v42 }
  0x39   : > { %340 = vmax.xlane.f32.xlu0 %v339_v45  ;;  %270 = vadd.xlane.f32.xlu1 %v269_v46 }
  0x3d   : > { %337 = vmax.xlane.f32.xlu0 %v336_v49  ;;  %267 = vadd.xlane.f32.xlu1 %v266_v50 }
  0x41   : > { %334 = vmax.xlane.f32.xlu0 %v333_v53  ;;  %264 = vadd.xlane.f32.xlu1 %v263_v54 }
  0x45   : > { %331 = vmax.xlane.f32.xlu0 %v330_v57  ;;  %261 = vadd.xlane.f32.xlu1 %v260_v58 }
  0x49   : > { %328 = vmax.xlane.f32.xlu0 %v327_v61  ;;  %258 = vadd.xlane.f32.xlu1 %v257_v62 }
  0x4d   : > { %325 = vmax.xlane.f32.xlu0 %v324_v63  ;;  %322 = vmax.xlane.f32.xlu1 %v321_v3 }
  0x63   : > { %424 = vperm.xlu0 %1107, %v370_v8  }
  0x9a   : > { %v368_v13 = vpop.xlane.xlu1 %367  ;;  %v304_v16 = vpop.xlane.xlu0 %303 }
  0x9b   : > { %v320_v17 = vmul.f32 0.00390625, %v304_v16 }
  0x9d   : > { %v421_v21 = vsel %vm405_vm1, %v320_v17, %v368_v13 }
  0x9e   : > { %1036 = vmatpush3.msra.mxu0 %v421_v21  ;;  %v301_v22 = vpop.xlane.xlu0 %300  ;;  %v298_v25 = vpop.xlane.xlu1 %297 }
  0x9f   : > { %1037 = vmatprep.subr.mxu0 %v1117_v20  ;;  %v319_v26 = vmul.f32 0.00390625, %v301_v22  ;;  %v318_v34 = vmul.f32 0.00390625, %v298_v25 }
  0xa2   : > { %v365_v29 = vpop.xlane.xlu0 %364  ;;  %v295_v30 = vpop.xlane.xlu1 %294 }
  0xa3   : > { %v420_v33 = vsel %vm405_vm1, %v319_v26, %v365_v29  ;;  %v317_v42 = vmul.f32 0.00390625, %v295_v30 }
  0xa4   : > { %1038 = vmatpush3.msra.mxu0 %v420_v33 }
  0xa5   : > { %1039 = vmatprep.subr.mxu0 %v1117_v20 }
  0xa6   : > { %v362_v37 = vpop.xlane.xlu0 %361  ;;  %v292_v38 = vpop.xlane.xlu1 %291 }
  0xa7   : > { %v419_v41 = vsel %vm405_vm1, %v318_v34, %v362_v37  ;;  %v316_v50 = vmul.f32 0.00390625, %v292_v38 }
  0xa8   : > { %1040 = vmatpush3.msra.mxu0 %v419_v41 }
  0xa9   : > { %1041 = vmatprep.subr.mxu0 %v1117_v20 }
  0xaa   : > { %v359_v45 = vpop.xlane.xlu0 %358  ;;  %v289_v46 = vpop.xlane.xlu1 %288 }
  0xab   : > { %v418_v49 = vsel %vm405_vm1, %v317_v42, %v359_v45  ;;  %v315_v58 = vmul.f32 0.00390625, %v289_v46 }
  0xac   : > { %1042 = vmatpush3.msra.mxu0 %v418_v49 }
  0xad   : > { %1043 = vmatprep.subr.mxu0 %v1117_v20 }
  0xae   : > { %v356_v53 = vpop.xlane.xlu0 %355  ;;  %v286_v54 = vpop.xlane.xlu1 %285 }
  0xaf   : > { %v417_v57 = vsel %vm405_vm1, %v316_v50, %v356_v53  ;;  %v314_v3 = vmul.f32 0.00390625, %v286_v54 }
  0xb0   : > { %1044 = vmatpush3.msra.mxu0 %v417_v57 }
  0xb1   : > { %1045 = vmatprep.subr.mxu0 %v1117_v20 }
  0xb2   : > { %v353_v61 = vpop.xlane.xlu0 %352  ;;  %v283_v62 = vpop.xlane.xlu1 %282 }
  0xb3   : > { %v416_v63 = vsel %vm405_vm1, %v315_v58, %v353_v61  ;;  %v313_v13 = vmul.f32 0.00390625, %v283_v62 }
  0xb4   : > { %1046 = vmatpush3.msra.mxu0 %v416_v63 }
  0xb5   : > { %1047 = vmatprep.subr.mxu0 %v1117_v20 }
  0xb6   : > { %v350_v4 = vpop.xlane.xlu0 %349  ;;  %v280_v8 = vpop.xlane.xlu1 %279 }
  0xb7   : > { %v415_v9 = vsel %vm405_vm1, %v314_v3, %v350_v4  ;;  %v312_v22 = vmul.f32 0.00390625, %v280_v8 }
  0xb8   : > { %1048 = vmatpush3.msra.mxu0 %v415_v9 }
  0xb9   : > { %1049 = vmatprep.subr.mxu0 %v1117_v20 }
  0xba   : > { %v347_v16 = vpop.xlane.xlu0 %346  ;;  %v277_v17 = vpop.xlane.xlu1 %276 }
  0xbb   : > { %v414_v21 = vsel %vm405_vm1, %v313_v13, %v347_v16  ;;  %v311_v30 = vmul.f32 0.00390625, %v277_v17 }
  0xbc   : > { %1050 = vmatpush3.msra.mxu0 %v414_v21  ;;  %v369_v21 = vld [vmem:[%s1589_s1] sm:$0xff] }
  0xbd   : > { %1051 = vmatprep.subr.mxu0 %v1117_v20 }
  0xbe   : > { %v344_v25 = vpop.xlane.xlu0 %343  ;;  %v274_v26 = vpop.xlane.xlu1 %273 }
  0xbf   : > { %v413_v29 = vsel %vm405_vm1, %v312_v22, %v344_v25  ;;  %v310_v38 = vmul.f32 0.00390625, %v274_v26  ;;  %v371_v25 = vld [vmem:[%s1591_s3] sm:$0xff] }
  0xc0   : > { %1052 = vmatpush3.msra.mxu0 %v413_v29  ;;  %1072 = vmatprep.mubr.msk.f32.mxu1 %vm498_vm2, %v371_v25 }
  0xc1   : > { %1053 = vmatprep.subr.mxu0 %v1117_v20 }
  0xc2   : > { %v341_v33 = vpop.xlane.xlu0 %340  ;;  %v271_v34 = vpop.xlane.xlu1 %270 }
  0xc3   : > { %v412_v37 = vsel %vm405_vm1, %v311_v30, %v341_v33  ;;  %v309_v46 = vmul.f32 0.00390625, %v271_v34 }
  0xc4   : > { %1054 = vmatpush3.msra.mxu0 %v412_v37  ;;  %v374_v37 = vld [vmem:[%s1591_s3 + $0x18] sm:$0xff] }
  0xc5   : > { %1055 = vmatprep.subr.mxu0 %v1117_v20 }
  0xc6   : > { %v338_v41 = vpop.xlane.xlu0 %337  ;;  %v268_v42 = vpop.xlane.xlu1 %267 }
  0xc7   : > { %v411_v45 = vsel %vm405_vm1, %v310_v38, %v338_v41  ;;  %v308_v54 = vmul.f32 0.00390625, %v268_v42  ;;  %v375_v38 = vld [vmem:[%s1591_s3 + $0x20] sm:$0xff]  ;;  %v376_v41 = vld [vmem:[%s1591_s3 + $0x28] sm:$0xff]  ;;  %v377_v42 = vld [vmem:[%s1591_s3 + $0x30] sm:$0xff] }
  0xc8   : > { %1056 = vmatpush3.msra.mxu0 %v411_v45  ;;  %v378_v45 = vld [vmem:[%s1591_s3 + $0x38] sm:$0xff] }
  0xc9   : > { %1057 = vmatprep.subr.mxu0 %v1117_v20 }
  0xca   : > { %v335_v49 = vpop.xlane.xlu0 %334  ;;  %v265_v50 = vpop.xlane.xlu1 %264 }
  0xcb   : > { %v410_v53 = vsel %vm405_vm1, %v309_v46, %v335_v49  ;;  %v307_v62 = vmul.f32 0.00390625, %v265_v50  ;;  %v379_v46 = vld [vmem:[%s1591_s3 + $0x40] sm:$0xff]  ;;  %v380_v49 = vld [vmem:[%s1591_s3 + $0x48] sm:$0xff]  ;;  %v381_v50 = vld [vmem:[%s1591_s3 + $0x50] sm:$0xff] }
  0xcc   : > { %1058 = vmatpush3.msra.mxu0 %v410_v53  ;;  %v382_v53 = vld [vmem:[%s1591_s3 + $0x58] sm:$0xff] }
  0xcd   : > { %1059 = vmatprep.subr.mxu0 %v1117_v20 }
  0xce   : > { %v332_v57 = vpop.xlane.xlu0 %331  ;;  %v262_v58 = vpop.xlane.xlu1 %261 }
  0xcf   : > { %v409_v61 = vsel %vm405_vm1, %v308_v54, %v332_v57  ;;  %v306_v8 = vmul.f32 0.00390625, %v262_v58  ;;  %v383_v54 = vld [vmem:[%s1591_s3 + $0x60] sm:$0xff]  ;;  %v384_v57 = vld [vmem:[%s1591_s3 + $0x68] sm:$0xff]  ;;  %v385_v58 = vld [vmem:[%s1591_s3 + $0x70] sm:$0xff] }
  0xd0   : > { %1060 = vmatpush3.msra.mxu0 %v409_v61  ;;  %v386_v61 = vld [vmem:[%s1591_s3 + $0x78] sm:$0xff] }
  0xd1   : > { %1061 = vmatprep.subr.mxu0 %v1117_v20 }
  0xd2   : > { %v329_v63 = vpop.xlane.xlu0 %328  ;;  %v259_v3 = vpop.xlane.xlu1 %258 }
  0xd3   : > { %v408_v4 = vsel %vm405_vm1, %v307_v62, %v329_v63  ;;  %v305_v9 = vmul.f32 0.00390625, %v259_v3 }
  0xd4   : > { %1062 = vmatpush3.msra.mxu0 %v408_v4 }
  0xd5   : > { %1063 = vmatprep.subr.mxu0 %v1117_v20 }
  0xd6   : > { %v326_v13 = vpop.xlane.xlu0 %325  ;;  %v323_v16 = vpop.xlane.xlu1 %322 }
  0xd7   : > { %v407_v17 = vsel %vm405_vm1, %v306_v8, %v326_v13  ;;  %v406_v22 = vsel %vm405_vm1, %v305_v9, %v323_v16 }
  0xd8   : > { %1064 = vmatpush3.msra.mxu0 %v407_v17 }
  0xd9   : > { %1065 = vmatprep.subr.mxu0 %v1117_v20  ;;  %v372_v20 = vld [vmem:[%s1591_s3 + $0x8] sm:$0xff] }
  0xda   : > { %1066 = vmatpush3.msra.mxu0 %v406_v22 }
  0xdb   : > { %1068 = vmatmul.mubr.f32.vlgmr.msra.gmra.mxu0 %v369_v21 }
  0xde   : > { %v425_v26 = vpop.permute.xlu0 %424 }
 0x19b   : > { %v493_v29 = vpop.f32.mrf.mxu0 }
 0x19c   : > { %v494_v30 = vadd.f32 %v493_v29, %v425_v26 }
 0x19d   : > { %v1069_v33 = vpop.f32.mrf.mxu0 }
 0x19e   : > { %v497_v34 = vmax.f32 %v494_v30, 0.0 }
 0x1a0   : > { %1070 = vmatprep.subr.mxu1 %v497_v34 }
 0x1a1   : > { %1071 = vmatpush3.msra.mxu1 %v497_v34 }
 0x1a2   : > { %1073 = vmatmul.mubr.msk.f32.vlgmr.msra.gmra.mxu1 %vm498_vm2, %v372_v20 }
 0x1a3   : > { %1075 = vmatprep.mubr.msk.f32.mxu1 %vm498_vm2, %v373_v12 }
 0x1a6   : > { %1076 = vmatmul.mubr.msk.f32.gmra.mxu1 %vm498_vm2, %v374_v37 }
 0x1a7   : > { %1078 = vmatprep.mubr.msk.f32.mxu1 %vm498_vm2, %v375_v38 }
 0x1aa   : > { %1079 = vmatmul.mubr.msk.f32.gmra.mxu1 %vm498_vm2, %v376_v41 }
 0x1ab   : > { %1081 = vmatprep.mubr.msk.f32.mxu1 %vm498_vm2, %v377_v42 }
 0x1ae   : > { %1082 = vmatmul.mubr.msk.f32.gmra.mxu1 %vm498_vm2, %v378_v45 }
 0x1af   : > { %1084 = vmatprep.mubr.msk.f32.mxu1 %vm498_vm2, %v379_v46 }
 0x1b2   : > { %1085 = vmatmul.mubr.msk.f32.gmra.mxu1 %vm498_vm2, %v380_v49 }
 0x1b3   : > { %1087 = vmatprep.mubr.msk.f32.mxu1 %vm498_vm2, %v381_v50 }
 0x1b6   : > { %1088 = vmatmul.mubr.msk.f32.gmra.mxu1 %vm498_vm2, %v382_v53 }
 0x1b7   : > { %1090 = vmatprep.mubr.msk.f32.mxu1 %vm498_vm2, %v383_v54 }
 0x1ba   : > { %1091 = vmatmul.mubr.msk.f32.gmra.mxu1 %vm498_vm2, %v384_v57 }
 0x1bb   : > { %1093 = vmatprep.mubr.msk.f32.mxu1 %vm498_vm2, %v385_v58 }
 0x1be   : > { %1094 = vmatmul.mubr.msk.f32.gmra.mxu1 %vm498_vm2, %v386_v61 }
 0x262   : > { %v1074_v62 = vpop.f32.mrf.mxu1 }
 0x263   : > { %v696_v63 = vsel %vm692_vm3, %v1074_v62, 0.0  ;;  %v388_v62 = vld [vmem:[%s1592_s4 + $0x8] sm:$0xff] }
 0x264   : > { %697 = vadd.xlane.f32.xlu1 %v696_v63  ;;  %v613_v3 = vpop.f32.mrf.mxu1  ;;  %v742_v63 = vmul.f32 2.0, %v388_v62  ;;  %v398_v62 = vld [vmem:[%s1592_s4 + $0x58] sm:$0xff] }
 0x265   : > { %v693_v8 = vsel %vm692_vm3, %v613_v3, 0.0  ;;  %v387_v3 = vld [vmem:[%s1592_s4] sm:$0xff] }
 0x266   : > { %v1077_v4 = vpop.f32.mrf.mxu1 }
 0x267   : > { %v702_v13 = vsel %vm692_vm3, %v1077_v4, 0.0 }
 0x268   : > { %694 = vadd.xlane.f32.xlu1 %v693_v8  ;;  %v623_v9 = vpop.f32.mrf.mxu1 }
 0x269   : > { %v699_v22 = vsel %vm692_vm3, %v623_v9, 0.0  ;;  %v741_v9 = vmul.f32 2.0, %v387_v3 }
 0x26a   : > { %v1080_v16 = vpop.f32.mrf.mxu1 }
 0x26b   : > { %v708_v26 = vsel %vm692_vm3, %v1080_v16, 0.0 }
 0x26c   : > { %703 = vadd.xlane.f32.xlu1 %v702_v13  ;;  %v633_v17 = vpop.f32.mrf.mxu1  ;;  %v390_v13 = vld [vmem:[%s1592_s4 + $0x18] sm:$0xff] }
 0x26d   : > { %v705_v34 = vsel %vm692_vm3, %v633_v17, 0.0 }
 0x26e   : > { %v1083_v21 = vpop.f32.mrf.mxu1 }
 0x26f   : > { %v714_v12 = vsel %vm692_vm3, %v1083_v21, 0.0  ;;  %v744_v21 = vmul.f32 2.0, %v390_v13 }
 0x270   : > { %700 = vadd.xlane.f32.xlu1 %v699_v22  ;;  %v643_v25 = vpop.f32.mrf.mxu1  ;;  %v389_v22 = vld [vmem:[%s1592_s4 + $0x10] sm:$0xff] }
 0x271   : > { %v711_v37 = vsel %vm692_vm3, %v643_v25, 0.0 }
 0x272   : > { %v1086_v29 = vpop.f32.mrf.mxu1 }
 0x273   : > { %v720_v38 = vsel %vm692_vm3, %v1086_v29, 0.0  ;;  %v743_v29 = vmul.f32 2.0, %v389_v22 }
 0x274   : > { %709 = vadd.xlane.f32.xlu1 %v708_v26  ;;  %v653_v30 = vpop.f32.mrf.mxu1 }
 0x275   : > { %v717_v41 = vsel %vm692_vm3, %v653_v30, 0.0  ;;  %v392_v30 = vld [vmem:[%s1592_s4 + $0x28] sm:$0xff] }
 0x276   : > { %v1089_v33 = vpop.f32.mrf.mxu1 }
 0x277   : > { %v726_v20 = vsel %vm692_vm3, %v1089_v33, 0.0 }
 0x278   : > { %706 = vadd.xlane.f32.xlu1 %v705_v34  ;;  %727 = vadd.xlane.f32.xlu0 %v726_v20  ;;  %v663_v42 = vpop.f32.mrf.mxu1  ;;  %v746_v20 = vmul.f32 2.0, %v392_v30  ;;  %v400_v30 = vld [vmem:[%s1592_s4 + $0x68] sm:$0xff] }
 0x279   : > { %v723_v45 = vsel %vm692_vm3, %v663_v42, 0.0  ;;  %v394_v42 = vld [vmem:[%s1592_s4 + $0x38] sm:$0xff] }
 0x27a   : > { %v1092_v46 = vpop.f32.mrf.mxu1 }
 0x27b   : > { %v732_v49 = vsel %vm692_vm3, %v1092_v46, 0.0 }
 0x27c   : > { %715 = vadd.xlane.f32.xlu1 %v714_v12  ;;  %v673_v50 = vpop.f32.mrf.mxu1  ;;  %v391_v12 = vld [vmem:[%s1592_s4 + $0x20] sm:$0xff] }
 0x27d   : > { %v729_v53 = vsel %vm692_vm3, %v673_v50, 0.0  ;;  %v393_v50 = vld [vmem:[%s1592_s4 + $0x30] sm:$0xff] }
 0x27e   : > { %v1095_v54 = vpop.f32.mrf.mxu1 }
 0x27f   : > { %v738_v57 = vsel %vm692_vm3, %v1095_v54, 0.0 }
 0x280   : > { %712 = vadd.xlane.f32.xlu1 %v711_v37  ;;  %v683_v58 = vpop.f32.mrf.mxu1 }
 0x281   : > { %v735_v61 = vsel %vm692_vm3, %v683_v58, 0.0  ;;  %v396_v58 = vld [vmem:[%s1592_s4 + $0x48] sm:$0xff] }
 0x282   : > { %v750_v3 = vmul.f32 2.0, %v396_v58 }
 0x284   : > { %721 = vadd.xlane.f32.xlu1 %v720_v38 }
 0x288   : > { %718 = vadd.xlane.f32.xlu1 %v717_v41  ;;  %v745_v41 = vmul.f32 2.0, %v391_v12  ;;  %v399_v12 = vld [vmem:[%s1592_s4 + $0x60] sm:$0xff] }
 0x28c   : > { %724 = vadd.xlane.f32.xlu1 %v723_v45 }
 0x290   : > { %733 = vadd.xlane.f32.xlu1 %v732_v49  ;;  %v748_v49 = vmul.f32 2.0, %v394_v42  ;;  %v402_v42 = vld [vmem:[%s1592_s4 + $0x78] sm:$0xff] }
 0x294   : > { %730 = vadd.xlane.f32.xlu1 %v729_v53 }
 0x298   : > { %739 = vadd.xlane.f32.xlu1 %v738_v57  ;;  %v747_v57 = vmul.f32 2.0, %v393_v50  ;;  %v401_v50 = vld [vmem:[%s1592_s4 + $0x70] sm:$0xff] }
 0x29c   : > { %736 = vadd.xlane.f32.xlu1 %v735_v61 }
 0x2ed   : > { %v698_v4 = vpop.xlane.xlu1 %697 }
 0x2ee   : > { %v758_v8 = vadd.f32 %v742_v63, %v698_v4  ;;  %v395_v4 = vld [vmem:[%s1592_s4 + $0x40] sm:$0xff] }
 0x2f0   : > { %780 = vperm.xlu0 %1107, %v758_v8   ;;  %v752_v8 = vmul.f32 2.0, %v398_v62 }
 0x2f1   : > { %v695_v16 = vpop.xlane.xlu1 %694 }
 0x2f2   : > { %v757_v17 = vadd.f32 %v741_v9, %v695_v16 }
 0x2f4   : > { %775 = vperm.xlu1 %1108, %v757_v17   ;;  %v749_v17 = vmul.f32 2.0, %v395_v4 }
 0x2f5   : > { %v704_v25 = vpop.xlane.xlu1 %703 }
 0x2f6   : > { %v760_v26 = vadd.f32 %v744_v21, %v704_v25  ;;  %v397_v21 = vld [vmem:[%s1592_s4 + $0x50] sm:$0xff] }
 0x2f8   : > { %790 = vperm.xlu1 %1108, %v760_v26  }
 0x2f9   : > { %v701_v33 = vpop.xlane.xlu1 %700 }
 0x2fa   : > { %v759_v34 = vadd.f32 %v743_v29, %v701_v33  ;;  %v751_v29 = vmul.f32 2.0, %v397_v21 }
 0x2fc   : > { %785 = vperm.xlu1 %1108, %v759_v34  }
 0x2fd   : > { %v710_v37 = vpop.xlane.xlu1 %709 }
 0x2fe   : > { %v762_v38 = vadd.f32 %v746_v20, %v710_v37  ;;  %v754_v20 = vmul.f32 2.0, %v400_v30 }
 0x300   : > { %800 = vperm.xlu1 %1108, %v762_v38  }
 0x301   : > { %v707_v45 = vpop.xlane.xlu1 %706  ;;  %v728_v13 = vpop.xlane.xlu0 %727 }
 0x302   : > { %v761_v46 = vadd.f32 %v745_v41, %v707_v45  ;;  %v768_v22 = vadd.f32 %v752_v8, %v728_v13  ;;  %v753_v41 = vmul.f32 2.0, %v399_v12 }
 0x304   : > { %795 = vperm.xlu1 %1108, %v761_v46  }
 0x305   : > { %v716_v53 = vpop.xlane.xlu1 %715 }
 0x306   : > { %v764_v54 = vadd.f32 %v748_v49, %v716_v53  ;;  %v756_v49 = vmul.f32 2.0, %v402_v42 }
 0x308   : > { %810 = vperm.xlu0 %1107, %v764_v54  }
 0x309   : > { %v713_v61 = vpop.xlane.xlu1 %712 }
 0x30a   : > { %v763_v63 = vadd.f32 %v747_v57, %v713_v61  ;;  %v755_v57 = vmul.f32 2.0, %v401_v50 }
 0x30c   : > { %805 = vperm.xlu1 %1108, %v763_v63  }
 0x30d   : > { %v722_v9 = vpop.xlane.xlu1 %721 }
 0x30e   : > { %v766_v16 = vadd.f32 %v750_v3, %v722_v9 }
 0x310   : > { %820 = vperm.xlu0 %1107, %v766_v16  }
 0x311   : > { %v719_v25 = vpop.xlane.xlu1 %718 }
 0x312   : > { %v765_v26 = vadd.f32 %v749_v17, %v719_v25 }
 0x314   : > { %830 = vperm.xlu0 %1107, %v768_v22   ;;  %815 = vperm.xlu1 %1108, %v765_v26  }
 0x315   : > { %v725_v33 = vpop.xlane.xlu1 %724 }
 0x316   : > { %v767_v34 = vadd.f32 %v751_v29, %v725_v33 }
 0x318   : > { %825 = vperm.xlu1 %1108, %v767_v34  }
 0x319   : > { %v734_v37 = vpop.xlane.xlu1 %733 }
 0x31a   : > { %v770_v38 = vadd.f32 %v754_v20, %v734_v37 }
 0x31c   : > { %840 = vperm.xlu0 %1107, %v770_v38  }
 0x31d   : > { %v731_v45 = vpop.xlane.xlu1 %730 }
 0x31e   : > { %v769_v46 = vadd.f32 %v753_v41, %v731_v45 }
 0x320   : > { %835 = vperm.xlu1 %1108, %v769_v46  }
 0x321   : > { %v740_v53 = vpop.xlane.xlu1 %739 }
 0x322   : > { %v772_v54 = vadd.f32 %v756_v49, %v740_v53 }
 0x324   : > { %850 = vperm.xlu0 %1107, %v772_v54  }
 0x325   : > { %v737_v58 = vpop.xlane.xlu1 %736 }
 0x326   : > { %v771_v61 = vadd.f32 %v755_v57, %v737_v58 }
 0x328   : > { %845 = vperm.xlu1 %1108, %v771_v61  }
 0x36b   : > { %v781_v62 = vpop.permute.xlu0 %780 }
 0x36c   : > { %v855_v63 = vmul.f32 %v781_v62, %v1306_v55  ;;  %v856_v3 = vmul.f32 %v781_v62, %v1309_v56 }
 0x36e   : > { %887 = vst [vmem:[%s1519_s28 + $0x10] sm:$0xff] %v855_v63  ;;  %888 = vst [vmem:[%s1519_s28 + $0x18] sm:$0xff] %v856_v3 }
 0x36f   : > { %v776_v4 = vpop.permute.xlu1 %775 }
 0x370   : > { %v853_v8 = vmul.f32 %v776_v4, %v1316_v59  ;;  %v854_v9 = vmul.f32 %v776_v4, %v1319_v60 }
 0x372   : > { %885 = vst [vmem:[%s1519_s28] sm:$0xff] %v853_v8  ;;  %886 = vst [vmem:[%s1519_s28 + $0x8] sm:$0xff] %v854_v9 }
 0x373   : > { %v791_v13 = vpop.permute.xlu1 %790 }
 0x374   : > { %v859_v16 = vmul.f32 %v791_v13, %v1286_v47  ;;  %v860_v55 = vmul.f32 %v791_v13, %v1289_v48 }
 0x376   : > { %891 = vst [vmem:[%s1519_s28 + $0x30] sm:$0xff] %v859_v16  ;;  %892 = vst [vmem:[%s1519_s28 + $0x38] sm:$0xff] %v860_v55 }
 0x377   : > { %v786_v56 = vpop.permute.xlu1 %785 }
 0x378   : > { %v857_v17 = vmul.f32 %v786_v56, %v1296_v51  ;;  %v858_v59 = vmul.f32 %v786_v56, %v1299_v52 }
 0x37a   : > { %889 = vst [vmem:[%s1519_s28 + $0x20] sm:$0xff] %v857_v17  ;;  %890 = vst [vmem:[%s1519_s28 + $0x28] sm:$0xff] %v858_v59 }
 0x37b   : > { %v801_v60 = vpop.permute.xlu1 %800 }
 0x37c   : > { %v863_v21 = vmul.f32 %v801_v60, %v1266_v39  ;;  %v864_v47 = vmul.f32 %v801_v60, %v1269_v40 }
 0x37e   : > { %895 = vst [vmem:[%s1519_s28 + $0x50] sm:$0xff] %v863_v21  ;;  %896 = vst [vmem:[%s1519_s28 + $0x58] sm:$0xff] %v864_v47 }
 0x37f   : > { %v796_v48 = vpop.permute.xlu1 %795 }
 0x380   : > { %v861_v22 = vmul.f32 %v796_v48, %v1276_v43  ;;  %v862_v51 = vmul.f32 %v796_v48, %v1279_v44 }
 0x382   : > { %893 = vst [vmem:[%s1519_s28 + $0x40] sm:$0xff] %v861_v22  ;;  %894 = vst [vmem:[%s1519_s28 + $0x48] sm:$0xff] %v862_v51 }
 0x383   : > { %v811_v52 = vpop.permute.xlu0 %810 }
 0x384   : > { %v867_v25 = vmul.f32 %v811_v52, %v1246_v31  ;;  %v868_v39 = vmul.f32 %v811_v52, %v1249_v32 }
 0x386   : > { %899 = vst [vmem:[%s1519_s28 + $0x70] sm:$0xff] %v867_v25  ;;  %900 = vst [vmem:[%s1519_s28 + $0x78] sm:$0xff] %v868_v39 }
 0x387   : > { %v806_v40 = vpop.permute.xlu1 %805 }
 0x388   : > { %v865_v26 = vmul.f32 %v806_v40, %v1256_v35  ;;  %v866_v43 = vmul.f32 %v806_v40, %v1259_v36 }
 0x38a   : > { %897 = vst [vmem:[%s1519_s28 + $0x60] sm:$0xff] %v865_v26  ;;  %898 = vst [vmem:[%s1519_s28 + $0x68] sm:$0xff] %v866_v43 }
 0x38b   : > { %v821_v44 = vpop.permute.xlu0 %820 }
 0x38c   : > { %v871_v29 = vmul.f32 %v821_v44, %v1226_v23  ;;  %v872_v31 = vmul.f32 %v821_v44, %v1229_v24 }
 0x38e   : > { %903 = vst [vmem:[%s1519_s28 + $0x90] sm:$0xff] %v871_v29  ;;  %904 = vst [vmem:[%s1519_s28 + $0x98] sm:$0xff] %v872_v31 }
 0x38f   : > { %v831_v32 = vpop.permute.xlu0 %830  ;;  %v816_v30 = vpop.permute.xlu1 %815 }
 0x390   : > { %v875_v35 = vmul.f32 %v831_v32, %v1205_v14  ;;  %v876_v36 = vmul.f32 %v831_v32, %v1208_v15  ;;  %v869_v33 = vmul.f32 %v816_v30, %v1236_v27  ;;  %v870_v34 = vmul.f32 %v816_v30, %v1239_v28 }
 0x392   : > { %907 = vst [vmem:[%s1519_s28 + $0xb0] sm:$0xff] %v875_v35  ;;  %908 = vst [vmem:[%s1519_s28 + $0xb8] sm:$0xff] %v876_v36 }
 0x393   : > { %901 = vst [vmem:[%s1519_s28 + $0x80] sm:$0xff] %v869_v33  ;;  %902 = vst [vmem:[%s1519_s28 + $0x88] sm:$0xff] %v870_v34  ;;  %v826_v23 = vpop.permute.xlu1 %825 }
 0x394   : > { %v873_v24 = vmul.f32 %v826_v23, %v1215_v18  ;;  %v874_v20 = vmul.f32 %v826_v23, %v1218_v19 }
 0x396   : > { %905 = vst [vmem:[%s1519_s28 + $0xa0] sm:$0xff] %v873_v24  ;;  %906 = vst [vmem:[%s1519_s28 + $0xa8] sm:$0xff] %v874_v20 }
 0x397   : > { %v841_v14 = vpop.permute.xlu0 %840 }
 0x398   : > { %v879_v15 = vmul.f32 %v841_v14, %v1185_v6  ;;  %v880_v27 = vmul.f32 %v841_v14, %v1188_v7 }
 0x39a   : > { %911 = vst [vmem:[%s1519_s28 + $0xd0] sm:$0xff] %v879_v15  ;;  %912 = vst [vmem:[%s1519_s28 + $0xd8] sm:$0xff] %v880_v27 }
 0x39b   : > { %v836_v28 = vpop.permute.xlu1 %835 }
 0x39c   : > { %v877_v12 = vmul.f32 %v836_v28, %v1195_v10  ;;  %v878_v18 = vmul.f32 %v836_v28, %v1198_v11 }
 0x39e   : > { %909 = vst [vmem:[%s1519_s28 + $0xc0] sm:$0xff] %v877_v12  ;;  %910 = vst [vmem:[%s1519_s28 + $0xc8] sm:$0xff] %v878_v18 }
 0x39f   : > { %v851_v19 = vpop.permute.xlu0 %850 }
 0x3a0   : > { %v883_v37 = vmul.f32 %v851_v19, %v1169_v0  ;;  %v884_v38 = vmul.f32 %v851_v19, %v1172_v1 }
 0x3a2   : > { %915 = vst [vmem:[%s1519_s28 + $0xf0] sm:$0xff] %v883_v37  ;;  %916 = vst [vmem:[%s1519_s28 + $0xf8] sm:$0xff] %v884_v38 }
 0x3a3   : > { %v846_v6 = vpop.permute.xlu1 %845 }
 0x3a4   : > { %v881_v7 = vmul.f32 %v846_v6, %v1175_v2  ;;  %v882_v41 = vmul.f32 %v846_v6, %v1182_v5 }
 0x3a6   : > { %913 = vst [vmem:[%s1519_s28 + $0xe0] sm:$0xff] %v881_v7  ;;  %914 = vst [vmem:[%s1519_s28 + $0xe8] sm:$0xff] %v882_v41 }
 0x3a7 PF: > { %s15_s18 = sadd.s32 1, %s1115_s18  }
 0x3a8   : > { %p12_p4 = scmp.ge.s32.totalorder %s15_s18, 4  }
 0x3aa   :  { %14 = sbr.rel (!%p12_p4) target bundleno = 1 (0x1), region = 70 }

</bundles_post_ra>
